<compile_context>
chip_gen: v7x
topology: tpu7x:2x2x1
jax: 0.10.0
libtpu: 0.0.40
codegen_flags: <defaults>
</compile_context>

<pallas_src>
import functools

import jax
import jax.numpy as jnp
from jax.experimental import pallas as pl
from jax.experimental.pallas import tpu as pltpu


def _pick_tile(dim, max_tile, quantum):
    """Largest tile <= max_tile that divides dim and is a multiple of quantum
    (falls back to the full dim, which is always a legal block)."""
    if dim <= max_tile:
        return dim
    t = (max_tile // quantum) * quantum
    while t > quantum and dim % t:
        t -= quantum
    return t if dim % t == 0 else dim


def _vmem_limit_bytes():
    # v7x has 64 MiB physical VMEM per TensorCore, v5e/v6e have 128 MiB.
    # Leave ~25% headroom for double-buffers and compiler scratch.
    try:
        cap = int(pltpu.get_tpu_info().vmem_capacity_bytes)
    except Exception:
        cap = 64 * 1024 * 1024
    return max(32 * 1024 * 1024, (cap * 3) // 4)


# ----------------- Kernel A: fused projection [emb(bf16) | residual(f32)+bias] -----------------
def _proj_kernel(h_ref, w_ref, wr_ref, b_ref, emb_ref, res_ref, *acc, single_k):
    def _epilogue(e, r):
        # emb[isnan] = 0 fused here (done once, not per dst tile in kernel B).
        emb_ref[...] = jnp.where(jnp.isnan(e), 0.0, e).astype(emb_ref.dtype)
        res_ref[...] = r + b_ref[...]

    if single_k:
        a = h_ref[...]
        _epilogue(jnp.dot(a, w_ref[...], preferred_element_type=jnp.float32),
                  jnp.dot(a, wr_ref[...], preferred_element_type=jnp.float32))
    else:
        acc_e, acc_r = acc

        @pl.when(pl.program_id(2) == 0)
        def _():
            acc_e[...] = jnp.zeros_like(acc_e)
            acc_r[...] = jnp.zeros_like(acc_r)

        a = h_ref[...]
        acc_e[...] += jnp.dot(a, w_ref[...], preferred_element_type=jnp.float32)
        acc_r[...] += jnp.dot(a, wr_ref[...], preferred_element_type=jnp.float32)

        @pl.when(pl.program_id(2) == pl.num_programs(2) - 1)
        def _():
            _epilogue(acc_e[...], acc_r[...])


def pallas_projection(h, w, w_res_hm, b_hm):
    """emb_bf16 = nan_to_zero(h @ W); res_f32 = h @ W_res_hm + b_hm, one pass over h."""
    M, K = h.shape
    HD = w.shape[1]
    tm = _pick_tile(M, 512, 16)          # 16: legal bf16 sublane quantum for emb output
    tn = _pick_tile(HD, 512, 128)
    tk = K if K <= 512 else _pick_tile(K, 512, 128)
    nk = K // tk
    single_k = nk == 1
    kernel = functools.partial(_proj_kernel, single_k=single_k)
    return pl.pallas_call(
        kernel,
        out_shape=(jax.ShapeDtypeStruct((M, HD), jnp.bfloat16),
                   jax.ShapeDtypeStruct((M, HD), jnp.float32)),
        grid=(M // tm, HD // tn, nk),
        in_specs=[pl.BlockSpec((tm, tk), lambda i, j, k: (i, k)),
                  pl.BlockSpec((tk, tn), lambda i, j, k: (k, j)),
                  pl.BlockSpec((tk, tn), lambda i, j, k: (k, j)),
                  pl.BlockSpec((1, tn), lambda i, j, k: (0, j))],
        out_specs=[pl.BlockSpec((tm, tn), lambda i, j, k: (i, j)),
                   pl.BlockSpec((tm, tn), lambda i, j, k: (i, j))],
        scratch_shapes=([] if single_k else
                        [pltpu.VMEM((tm, tn), jnp.float32),
                         pltpu.VMEM((tm, tn), jnp.float32)]),
        compiler_params=pltpu.CompilerParams(
            dimension_semantics=("parallel", "parallel", "arbitrary")),
    )(h, w, w_res_hm, b_hm)


# ------ Kernel B: edge-softmax attention (online over src tiles) + aggregation + epilogue ------
def _hgn_attn_kernel(et_ref, emb_ref, res_ref, el_ref, er_ref, hetab_ref, out_ref,
                     m_sc, l_sc, acc_sc, *, group_heads, head_dim, num_etypes,
                     n_groups, negative_slope):
    G, D = group_heads, head_dim
    g = pl.program_id(0)
    j = pl.program_id(2)

    @pl.when(j == 0)
    def _():
        m_sc[...] = jnp.full_like(m_sc, -1e30)
        l_sc[...] = jnp.zeros_like(l_sc)
        acc_sc[...] = jnp.zeros_like(acc_sc)

    et = et_ref[...].astype(jnp.int32)           # (T_dst, T_src) edge types (int8 stream)
    emb_bf = emb_ref[...]                        # (T_src, G*D) bf16, NaN already cleaned
    el = el_ref[0]                               # (G, T_src)  a_l . emb[src]
    er = er_ref[0]                               # (T_dst, G)  a_r . emb[dst]

    # Edge-type masks + "no edge" bias: computed ONCE per grid step, shared by all heads.
    masks = [(et == t).astype(jnp.float32) for t in range(num_etypes)]
    no_edge = jnp.where(et == num_etypes, -1e30, 0.0)    # sentinel -> softmax weight 0

    for hh in range(G):
        head = hh if n_groups == 1 else g * G + hh
        he = no_edge
        for t in range(num_etypes):               # mask-weighted sum of SMEM scalars
            he = he + masks[t] * hetab_ref[t, head]

        logit = el[hh:hh + 1, :] + er[:, hh:hh + 1] + he
        logit = jnp.where(logit >= 0, logit, negative_slope * logit)   # LeakyReLU

        # online softmax over src tiles
        m_prev = m_sc[:, hh:hh + 1]
        m_new = jnp.maximum(m_prev, jnp.max(logit, axis=1, keepdims=True))
        corr = jnp.exp(m_prev - m_new)
        p = jnp.exp(logit - m_new)
        l_sc[:, hh:hh + 1] = corr * l_sc[:, hh:hh + 1] + jnp.sum(p, axis=1, keepdims=True)
        acc_sc[:, hh * D:(hh + 1) * D] = (
            corr * acc_sc[:, hh * D:(hh + 1) * D]
            + jnp.dot(p.astype(jnp.bfloat16), emb_bf[:, hh * D:(hh + 1) * D],
                      preferred_element_type=jnp.float32))
        m_sc[:, hh:hh + 1] = m_new

    @pl.when(j == pl.num_programs(2) - 1)
    def _():
        inv = pl.reciprocal(l_sc[...], approx=True)          # EUP
        inv = jnp.where(m_sc[...] > -1e20, inv, 0.0)         # isolated dst -> 0 aggregation
        res = res_ref[...]                                    # residual, bias already added
        outs = []
        for hh in range(G):
            z = (acc_sc[:, hh * D:(hh + 1) * D] * inv[:, hh:hh + 1]
                 + res[:, hh * D:(hh + 1) * D])
            outs.append(jnp.where(z > 0, z, jnp.exp(jnp.minimum(z, 0.0)) - 1.0))   # ELU
        out_ref[...] = jnp.concatenate(outs, axis=1)          # lane-dense (T_dst, G*D) store


def pallas_hgn_attention(et_dense, emb_bf, res, el_g, er_g, he_table, *,
                         num_heads, head_dim, group_heads, num_etypes,
                         negative_slope, dst_tile, src_tile):
    Nn, HD = emb_bf.shape
    G, D, H = group_heads, head_dim, num_heads
    n_groups = H // G
    n_dst = Nn // dst_tile
    n_src = Nn // src_tile
    assert n_groups == 1 or (G * D) % 128 == 0

    kernel = functools.partial(
        _hgn_attn_kernel, group_heads=G, head_dim=D, num_etypes=num_etypes,
        n_groups=n_groups, negative_slope=negative_slope)

    return pl.pallas_call(
        kernel,
        out_shape=jax.ShapeDtypeStruct((Nn, HD), jnp.float32),
        grid=(n_groups, n_dst, n_src),
        in_specs=[
            pl.BlockSpec((dst_tile, src_tile), lambda g, i, j: (i, j)),   # edge types int8
            pl.BlockSpec((src_tile, G * D), lambda g, i, j: (j, g)),      # emb[src] bf16
            pl.BlockSpec((dst_tile, G * D), lambda g, i, j: (i, g)),      # residual+bias f32
            pl.BlockSpec((1, G, src_tile), lambda g, i, j: (g, 0, j)),    # a_l . emb[src]
            pl.BlockSpec((1, dst_tile, G), lambda g, i, j: (g, i, 0)),    # a_r . emb[dst]
            pl.BlockSpec(memory_space=pltpu.MemorySpace.SMEM),            # (T, H) h_e table
        ],
        out_specs=pl.BlockSpec((dst_tile, G * D), lambda g, i, j: (i, g)),
        scratch_shapes=[pltpu.VMEM((dst_tile, G), jnp.float32),       # running max
                        pltpu.VMEM((dst_tile, G), jnp.float32),       # running sum
                        pltpu.VMEM((dst_tile, G * D), jnp.float32)],  # running weighted sum
        compiler_params=pltpu.CompilerParams(
            dimension_semantics=("parallel", "parallel", "arbitrary"),
            vmem_limit_bytes=_vmem_limit_bytes()),
    )(et_dense, emb_bf, res, el_g, er_g, he_table)


# ------------------------------ Full forward pass ------------------------------
def simple_hgn_conv(h, params, src, dst, etype, *, num_nodes, num_heads,
                    out_dim, edge_dim, negative_slope=0.2):
    N, H, D = num_nodes, num_heads, out_dim
    HD = H * D
    T = params["edge_emb"].shape[0]

    # ---- tiny parameter-only prep (XLA glue) ----
    # Residual weights / bias permuted from d-major (d*H+h) to head-major (h*D+d) so the
    # residual + bias + ELU epilogue can use the kernel's lane-dense head-major layout.
    W_res_hm = params["W_res"].reshape(-1, D, H).transpose(0, 2, 1).reshape(-1, HD)
    b_hm = params["b_res"].reshape(D, H).T.reshape(1, HD)

    # Per-(etype, head) attention bias (TypedLinear on edge_emb + a_e reduction) -> SMEM table.
    trans = jnp.einsum("tk,tko->to", params["edge_emb"],
                       params["W_r"]).reshape(T, H, edge_dim)
    he_table = jnp.sum(params["a_e"][None] * trans, axis=-1)          # (T, H)

    # Dense per-(dst, src) edge type in int8; sentinel T = "no edge".
    # TODO(synk): parallel edges on the same (dst, src) pair collapse (last write wins),
    #             diverging from an edge-list multigraph reference.
    et_dtype = jnp.int8 if T < 127 else jnp.int32
    et_dense = jnp.full((N, N), T, et_dtype).at[dst, src].set(etype.astype(et_dtype))

    # Head grouping for lane-dense blocks.
    if HD <= 128:
        G = H
    else:
        G = max(1, 128 // D)
        while G > 1 and H % G:
            G -= 1
        if (G * D) % 128 != 0:          # keep BlockSpec lane dims legal
            G = H
    n_groups = H // G

    # Kernel A: fused projection; emb in bf16 (NaN-cleaned), residual in f32 with bias added.
    emb_bf, res = pallas_projection(h, params["W"], W_res_hm, b_hm)

    # Per-node attention terms (a_l/a_r . emb), hoisted out of kernel B (O(N*H*D) work only).
    emb_f = emb_bf.astype(jnp.float32).reshape(N, H, D)
    el = jnp.einsum("nhd,hd->nh", emb_f, params["a_l"])               # (N, H)
    er = jnp.einsum("nhd,hd->nh", emb_f, params["a_r"])               # (N, H)
    el_g = el.T.reshape(n_groups, G, N)
    er_g = er.reshape(N, n_groups, G).transpose(1, 0, 2)

    # Tile selection (int8 edge types want dst tiles that are multiples of 32).
    dst_tile = _pick_tile(N, 256, 32)
    src_tile = _pick_tile(N, 512, 128)
    if n_groups == 1 and N // dst_tile == 1 and N % 64 == 0:
        dst_tile = N // 2     # keep both v7x TensorCores busy even at small N

    out_hm = pallas_hgn_attention(
        et_dense, emb_bf, res, el_g, er_g, he_table,
        num_heads=H, head_dim=D, group_heads=G, num_etypes=T,
        negative_slope=negative_slope, dst_tile=dst_tile, src_tile=src_tile)

    # Reorder columns to the module's emb.permute(0, 2, 1).view(-1, D*H) flattening.
    return out_hm.reshape(N, H, D).transpose(0, 2, 1).reshape(N, D * H)


# ----------------------------- pure-JAX reference -----------------------------
def reference_forward(h, params, src, dst, etype, *, num_nodes, num_heads,
                      out_dim, edge_dim, negative_slope=0.2):
    N, H, D = num_nodes, num_heads, out_dim
    emb = h @ params["W"]
    emb = jnp.where(jnp.isnan(emb), 0.0, emb).reshape(N, H, D)
    trans = jnp.einsum("ek,eko->eo", params["edge_emb"][etype], params["W_r"][etype])
    trans = trans.reshape(-1, H, edge_dim)
    h_l = jnp.sum(params["a_l"][None] * emb, -1)[src]
    h_r = jnp.sum(params["a_r"][None] * emb, -1)[dst]
    h_e = jnp.sum(params["a_e"][None] * trans, -1)
    att = h_l + h_r + h_e
    att = jnp.where(att >= 0, att, negative_slope * att)
    m = jax.ops.segment_max(att, dst, num_segments=N)
    p = jnp.exp(att - m[dst])
    s = jax.ops.segment_sum(p, dst, num_segments=N)
    alpha = p / s[dst]
    out = jax.ops.segment_sum(emb[src] * alpha[:, :, None], dst, num_segments=N)
    out = jnp.transpose(out, (0, 2, 1)).reshape(N, D * H)
    z = out + (h @ params["W_res"] + params["b_res"])
    return jnp.where(z > 0, z, jnp.exp(z) - 1.0)


def _xavier(key, shape, gain=1.414):
    fan_in, fan_out = shape[-2], shape[-1]
    a = gain * (6.0 / (fan_in + fan_out)) ** 0.5
    return jax.random.uniform(key, shape, jnp.float32, -a, a)


if __name__ == "__main__":
    # Small config consistent with the module's __init__.
    N_NODES, IN_DIM, OUT_DIM, NUM_HEADS = 64, 32, 16, 4
    EDGE_DIM, NUM_ETYPES = 8, 3

    key = jax.random.PRNGKey(0)
    ks = jax.random.split(key, 9)

    params = {
        "edge_emb": _xavier(ks[0], (NUM_ETYPES, EDGE_DIM)),
        "W":        _xavier(ks[1], (IN_DIM, OUT_DIM * NUM_HEADS)),
        "W_r":      _xavier(ks[2], (NUM_ETYPES, EDGE_DIM, EDGE_DIM * NUM_HEADS)),
        "a_l":      _xavier(ks[3], (NUM_HEADS, OUT_DIM)),
        "a_r":      _xavier(ks[4], (NUM_HEADS, OUT_DIM)),
        "a_e":      _xavier(ks[5], (NUM_HEADS, EDGE_DIM)),
        "W_res":    _xavier(ks[6], (IN_DIM, OUT_DIM * NUM_HEADS)),
        "b_res":    jax.random.uniform(ks[7], (OUT_DIM * NUM_HEADS,),
                                       jnp.float32, -0.1, 0.1),
    }

    # Deterministic simple graph: each node i receives edges from i+1, i+3, i+7 (mod N).
    nodes = jnp.arange(N_NODES, dtype=jnp.int32)
    src = jnp.concatenate([(nodes + 1) % N_NODES,
                           (nodes + 3) % N_NODES,
                           (nodes + 7) % N_NODES])
    dst = jnp.concatenate([nodes, nodes, nodes])
    etype = (jnp.arange(src.shape[0], dtype=jnp.int32) % NUM_ETYPES)

    h = jax.random.normal(ks[8], (N_NODES, IN_DIM), jnp.float32)

    out = simple_hgn_conv(h, params, src, dst, etype,
                          num_nodes=N_NODES, num_heads=NUM_HEADS,
                          out_dim=OUT_DIM, edge_dim=EDGE_DIM)
    out = jax.block_until_ready(out)

    ref = reference_forward(h, params, src, dst, etype,
                            num_nodes=N_NODES, num_heads=NUM_HEADS,
                            out_dim=OUT_DIM, edge_dim=EDGE_DIM)
    ref = jax.block_until_ready(ref)

    assert out.shape == (N_NODES, OUT_DIM * NUM_HEADS)
    # bf16 projection (logits + aggregation) + approx reciprocal -> looser tolerance than f32.
    assert jnp.allclose(out, ref, rtol=5e-2, atol=5e-2), "mismatch vs reference"

    print("KERNEL_OK")
</pallas_src>

<mosaic_0001>
module attributes {stable_mosaic.version = 11 : i64} {
  func.func @_proj_kernel(%arg0: i32, %arg1: i32, %arg2: i32, %arg3: memref<64x32xf32, #tpu.memory_space<vmem>>, %arg4: memref<32x64xf32, #tpu.memory_space<vmem>>, %arg5: memref<32x64xf32, #tpu.memory_space<vmem>>, %arg6: memref<1x64xf32, #tpu.memory_space<vmem>>, %arg7: memref<64x64xbf16, #tpu.memory_space<vmem>>, %arg8: memref<64x64xf32, #tpu.memory_space<vmem>>) attributes {dimension_semantics = [#tpu.dimension_semantics<parallel>, #tpu.dimension_semantics<parallel>, #tpu.dimension_semantics<arbitrary>], iteration_bounds = array<i64: 1, 1, 1>, scalar_prefetch = 0 : i64, scratch_operands = 0 : i64, tpu.core_type = #tpu.core_type<tc>, window_params = [{transform_indices = @transform_0, window_bounds = array<i64: 64, 32>}, {transform_indices = @transform_1, window_bounds = array<i64: 32, 64>}, {transform_indices = @transform_2, window_bounds = array<i64: 32, 64>}, {transform_indices = @transform_3, window_bounds = array<i64: 1, 64>}, {transform_indices = @transform_4, window_bounds = array<i64: 64, 64>}, {transform_indices = @transform_5, window_bounds = array<i64: 64, 64>}]} {
    %c0 = arith.constant 0 : index
    %c0_0 = arith.constant 0 : index
    %0 = vector.load %arg3[%c0, %c0_0] : memref<64x32xf32, #tpu.memory_space<vmem>>, vector<64x32xf32>
    %c0_1 = arith.constant 0 : index
    %c0_2 = arith.constant 0 : index
    %1 = vector.load %arg4[%c0_1, %c0_2] : memref<32x64xf32, #tpu.memory_space<vmem>>, vector<32x64xf32>
    %cst = arith.constant dense<0.000000e+00> : vector<64x64xf32>
    %2 = tpu.matmul %0, %1, %cst {dimension_numbers = #tpu.dot_dimension_numbers<[1], [0], [0], [1], [0, 0, 1, 1], [], []>} : vector<64x32xf32>, vector<32x64xf32>, vector<64x64xf32> -> vector<64x64xf32>
    %c0_3 = arith.constant 0 : index
    %c0_4 = arith.constant 0 : index
    %3 = vector.load %arg5[%c0_3, %c0_4] : memref<32x64xf32, #tpu.memory_space<vmem>>, vector<32x64xf32>
    %cst_5 = arith.constant dense<0.000000e+00> : vector<64x64xf32>
    %4 = tpu.matmul %0, %3, %cst_5 {dimension_numbers = #tpu.dot_dimension_numbers<[1], [0], [0], [1], [0, 0, 1, 1], [], []>} : vector<64x32xf32>, vector<32x64xf32>, vector<64x64xf32> -> vector<64x64xf32>
    %5 = arith.cmpf one, %2, %2 : vector<64x64xf32>
    %cst_6 = arith.constant 0.000000e+00 : f32
    %6 = vector.broadcast %cst_6 : f32 to vector<64x64xf32>
    %7 = arith.select %5, %6, %2 : vector<64x64xi1>, vector<64x64xf32>
    %8 = arith.truncf %7 : vector<64x64xf32> to vector<64x64xbf16>
    %c0_7 = arith.constant 0 : index
    %c0_8 = arith.constant 0 : index
    %9 = vector.load %arg7[%c0_7, %c0_8] : memref<64x64xbf16, #tpu.memory_space<vmem>>, vector<64x64xbf16>
    tpu.vector_store %arg7[%c0_7, %c0_8], %8 {strides = array<i32>} : memref<64x64xbf16, #tpu.memory_space<vmem>>, vector<64x64xbf16>,
    %c0_9 = arith.constant 0 : index
    %c0_10 = arith.constant 0 : index
    %10 = vector.load %arg6[%c0_9, %c0_10] : memref<1x64xf32, #tpu.memory_space<vmem>>, vector<1x64xf32>
    %11 = vector.broadcast %10 : vector<1x64xf32> to vector<64x64xf32>
    %12 = arith.addf %4, %11 : vector<64x64xf32>
    %c0_11 = arith.constant 0 : index
    %c0_12 = arith.constant 0 : index
    %13 = vector.load %arg8[%c0_11, %c0_12] : memref<64x64xf32, #tpu.memory_space<vmem>>, vector<64x64xf32>
    tpu.vector_store %arg8[%c0_11, %c0_12], %12 {strides = array<i32>} : memref<64x64xf32, #tpu.memory_space<vmem>>, vector<64x64xf32>,
    return
  }
  func.func @transform_0(%arg0: i32, %arg1: i32, %arg2: i32) -> (i32, i32) {
    %c0_i32 = arith.constant 0 : i32
    return %arg0, %arg2 : i32, i32
  }
  func.func @transform_1(%arg0: i32, %arg1: i32, %arg2: i32) -> (i32, i32) {
    %c0_i32 = arith.constant 0 : i32
    return %arg2, %arg1 : i32, i32
  }
  func.func @transform_2(%arg0: i32, %arg1: i32, %arg2: i32) -> (i32, i32) {
    %c0_i32 = arith.constant 0 : i32
    return %arg2, %arg1 : i32, i32
  }
  func.func @transform_3(%arg0: i32, %arg1: i32, %arg2: i32) -> (i32, i32) {
    %c0_i32 = arith.constant 0 : i32
    %c0_i32_0 = arith.constant 0 : i32
    return %c0_i32, %arg1 : i32, i32
  }
  func.func @transform_4(%arg0: i32, %arg1: i32, %arg2: i32) -> (i32, i32) {
    %c0_i32 = arith.constant 0 : i32
    return %arg0, %arg1 : i32, i32
  }
  func.func @transform_5(%arg0: i32, %arg1: i32, %arg2: i32) -> (i32, i32) {
    %c0_i32 = arith.constant 0 : i32
    return %arg0, %arg1 : i32, i32
  }
}

</mosaic_0001>

<bundles_post_ra>
// kernel: tpu_custom_call.1
= control target key start
LH: loop header
LB: loop body
LE: loop exit
PB: predicated region body
PF: predicated region fallthrough
CT: control target
= control target key end

     0   :  { %11 = vsyncpa [#allocation3], 0  ;;  %vm33_vm0 = vcmask 261120   ;;  %s704_s0 = inlined_call_operand.vmem [shape: f32[64,32], index: 0, kind: input, shape index: {}]   ;;  %s705_s1 = inlined_call_operand.vmem [shape: f32[32,64], index: 1, kind: input, shape index: {}]   ;;  %s706_s2 = inlined_call_operand.vmem [shape: f32[32,64], index: 2, kind: input, shape index: {}]   ;;  %s707_s3 = inlined_call_operand.vmem [shape: f32[1,64], index: 3, kind: input, shape index: {}]   ;;  %s708_s4 = inlined_call_operand.hbm [shape: bf16[64,64], index: 4, kind: output, shape index: {0}]   ;;  %s709_s5 = inlined_call_operand.hbm [shape: f32[64,64], index: 5, kind: output, shape index: {1}]  }
   0x1   :  { %v29_v0 = vld [vmem:[%s705_s1] sm:$0xff]  ;;  %v30_v1 = vld [vmem:[%s705_s1 + $0x8] sm:$0xff]  ;;  %v31_v5 = vld [vmem:[%s705_s1 + $0x10] sm:$0xff] }
   0x2   :  { %v163_v2 = vld [vmem:[%s706_s2] sm:$0xff]  ;;  %v474_v3 = vpack.c.bf16 %v30_v1, %v29_v0  ;;  %v164_v4 = vld [vmem:[%s706_s2 + $0x8] sm:$0xff]  ;;  %v32_v6 = vld [vmem:[%s705_s1 + $0x18] sm:$0xff] }
   0x3   :  { %v482_v7 = vpack.c.bf16 %v164_v4, %v163_v2  ;;  %v478_v8 = vpack.c.bf16 %v32_v6, %v31_v5  ;;  %v165_v9 = vld [vmem:[%s706_s2 + $0x10] sm:$0xff]  ;;  %v166_v10 = vld [vmem:[%s706_s2 + $0x18] sm:$0xff]  ;;  %v21_v11 = vld [vmem:[%s704_s0] sm:$0xff] }
   0x4   :  { %475 = vmatprep.subr.bf16.mxu0 %v474_v3  ;;  %v486_v12 = vpack.c.bf16 %v166_v10, %v165_v9  ;;  %442 = vmatprep.mubr.msk.f32.mxu0 %vm33_vm0, %v21_v11 }
   0x5   :  { %477 = vmatpush3.bf16.msra.mxu0 %v474_v3  ;;  %483 = vmatprep.subr.bf16.mxu1 %v482_v7 }
   0x6   :  { %485 = vmatpush3.bf16.msra.mxu1 %v482_v7  ;;  %479 = vmatprep.subr.bf16.mxu0 %v478_v8 }
   0x7   :  { %12 = vsyncpa [#allocation5], 0  ;;  %487 = vmatprep.subr.bf16.mxu1 %v486_v12  ;;  %462 = vmatprep.mubr.msk.f32.mxu1 %vm33_vm0, %v21_v11  ;;  %v22_v13 = vld [vmem:[%s704_s0 + $0x8] sm:$0xff]  ;;  %v23_v14 = vld [vmem:[%s704_s0 + $0x10] sm:$0xff]  ;;  %vm336_vm2 = vcmask 523264   ;;  %vm215_vm3 = vcmask 519168  }
   0x8   :  { %v24_v15 = vld [vmem:[%s704_s0 + $0x18] sm:$0xff]  ;;  %v25_v16 = vld [vmem:[%s704_s0 + $0x20] sm:$0xff]  ;;  %v26_v17 = vld [vmem:[%s704_s0 + $0x28] sm:$0xff]  ;;  %s545_s25 = smov [#allocation4]  }
   0x9   :  { %481 = vmatpush3.bf16.msra.mxu0 %v478_v8  ;;  %v27_v18 = vld [vmem:[%s704_s0 + $0x30] sm:$0xff]  ;;  %v28_v19 = vld [vmem:[%s704_s0 + $0x38] sm:$0xff]  ;;  %v647_v20 = vld [vmem:[%s707_s3] ss:$0 sm:$0xff]  ;;  %s544_s0 = smov [#allocation2]   ;;  %s362_s26 = sshll.u32 %s545_s25, 4  ;;  %s363_s26 = int_to_ptr.vmem [resolvable:$true] %s362_s26 }
   0xa   :  { %489 = vmatpush3.bf16.msra.mxu1 %v486_v12  ;;  %s350_s3 = sshll.u32 %s544_s0, 4  ;;  %s496_s27 = scalar_lea.vmem %s363_s26, 1024  ;;  %s668_s3 = int_to_ptr.vmem [resolvable:$true] %s350_s3 }
   0xb   :  { %p497_p0 = scmp.ne.s32.totalorder %s363_s26, %s496_s27  ;;  %p501_p1 = scmp.lt.s32.totalorder %s363_s26, %s363_s26 }
   0xc   :  { %443 = vmatmul.mubr.msk.f32.vlgmr.msra.gmra.mrb[0].mxu0 %vm33_vm0, %v22_v13  ;;  %p502_p2 = scmp.lt.s32.totalorder %s496_s27, %s496_s27 }
   0xd   :  { %463 = vmatmul.mubr.msk.f32.vlgmr.msra.gmra.mrb[0].mxu1 %vm33_vm0, %v22_v13  ;;  %445 = vmatprep.mubr.msk.f32.mxu0 %vm33_vm0, %v23_v14 }
   0xe   :  { %465 = vmatprep.mubr.msk.f32.mxu1 %vm33_vm0, %v23_v14  ;;  %p503_p3 = por %p502_p2, %p501_p1 }
  0x10   :  { %446 = vmatmul.mubr.msk.f32.gmra.mrb[2].mxu0 %vm33_vm0, %v24_v15  ;;  %p504_p4 = pnand %p503_p3, %p497_p0 }
  0x11   :  { %466 = vmatmul.mubr.msk.f32.gmra.mrb[2].mxu1 %vm33_vm0, %v24_v15  ;;  %448 = vmatprep.mubr.msk.f32.mxu0 %vm33_vm0, %v25_v16 }
  0x12   :  { %468 = vmatprep.mubr.msk.f32.mxu1 %vm33_vm0, %v25_v16 }
  0x14   :  { %449 = vmatmul.mubr.msk.f32.gmra.mrb[4].mxu0 %vm33_vm0, %v26_v17 }
  0x15   :  { %469 = vmatmul.mubr.msk.f32.gmra.mrb[4].mxu1 %vm33_vm0, %v26_v17  ;;  %451 = vmatprep.mubr.msk.f32.mxu0 %vm33_vm0, %v27_v18 }
  0x16   :  { %471 = vmatprep.mubr.msk.f32.mxu1 %vm33_vm0, %v27_v18 }
  0x18   :  { %452 = vmatmul.mubr.msk.f32.gmra.mrb[6].mxu0 %vm33_vm0, %v28_v19 }
  0x19   :  { %472 = vmatmul.mubr.msk.f32.gmra.mrb[6].mxu1 %vm33_vm0, %v28_v19 }
  0xdf   :  { %v444_v21 = vpop.f32.mrb[0].mxu0 }
  0xe0   :  { %vm168_vm1 = vcmp.ne.f32.partialorder %v444_v21, %v444_v21  ;;  %v124_v22 = vpop.f32.mrb[1].mxu0  ;;  %v464_v23 = vpop.f32.mrb[0].mxu1 }
  0xe1   :  { %v176_v24 = vsel %vm168_vm1, 0.0, %v444_v21  ;;  %vm167_vm4 = vcmp.ne.f32.partialorder %v124_v22, %v124_v22  ;;  %v303_v25 = vadd.f32 %v464_v23, %v647_v20  ;;  %v297_v26 = vpop.f32.mrb[1].mxu1 }
  0xe2   :  { %v403_v27 = vpack.c.bf16 %v176_v24, %v176_v24  ;;  %v175_v28 = vsel %vm167_vm4, 0.0, %v124_v22  ;;  %v298_v29 = vadd.f32 %v647_v20, %v297_v26 }
  0xe3   :  { %v402_v30 = vpack.c.bf16 %v175_v28, %v175_v28  ;;  %338 = vst.msk [vmem:[#allocation4 + $0x8] sm:$0xff] %vm336_vm2, %v303_v25  ;;  %v447_v31 = vpop.f32.mrb[2].mxu0 }
  0xe4   :  { %217 = vst.msk [vmem:[#allocation2 + $0x4] sm:$0xf] %vm215_vm3, %v403_v27  ;;  %vm170_vm5 = vcmp.ne.f32.partialorder %v447_v31, %v447_v31  ;;  %v134_v32 = vpop.f32.mrb[3].mxu0  ;;  %v467_v33 = vpop.f32.mrb[2].mxu1 }
  0xe5   :  { %337 = vst.msk [vmem:[#allocation4] sm:$0xff] %vm336_vm2, %v298_v29  ;;  %v178_v34 = vsel %vm170_vm5, 0.0, %v447_v31  ;;  %vm169_vm6 = vcmp.ne.f32.partialorder %v134_v32, %v134_v32  ;;  %v313_v35 = vadd.f32 %v467_v33, %v647_v20  ;;  %v307_v36 = vpop.f32.mrb[3].mxu1 }
  0xe6   :  { %216 = vst.msk [vmem:[#allocation2] sm:$0xf] %vm215_vm3, %v402_v30  ;;  %v405_v37 = vpack.c.bf16 %v178_v34, %v178_v34  ;;  %v177_v38 = vsel %vm169_vm6, 0.0, %v134_v32  ;;  %v308_v39 = vadd.f32 %v647_v20, %v307_v36 }
  0xe7   :  { %v404_v40 = vpack.c.bf16 %v177_v38, %v177_v38  ;;  %340 = vst.msk [vmem:[#allocation4 + $0x18] sm:$0xff] %vm336_vm2, %v313_v35  ;;  %v450_v41 = vpop.f32.mrb[4].mxu0 }
  0xe8   :  { %219 = vst.msk [vmem:[#allocation2 + $0xc] sm:$0xf] %vm215_vm3, %v405_v37  ;;  %vm172_vm7 = vcmp.ne.f32.partialorder %v450_v41, %v450_v41  ;;  %v144_v42 = vpop.f32.mrb[5].mxu0  ;;  %v470_v43 = vpop.f32.mrb[4].mxu1 }
  0xe9   :  { %339 = vst.msk [vmem:[#allocation4 + $0x10] sm:$0xff] %vm336_vm2, %v308_v39  ;;  %v180_v44 = vsel %vm172_vm7, 0.0, %v450_v41  ;;  %vm171_vm8 = vcmp.ne.f32.partialorder %v144_v42, %v144_v42  ;;  %v323_v45 = vadd.f32 %v470_v43, %v647_v20  ;;  %v317_v46 = vpop.f32.mrb[5].mxu1 }
  0xea   :  { %218 = vst.msk [vmem:[#allocation2 + $0x8] sm:$0xf] %vm215_vm3, %v404_v40  ;;  %v407_v47 = vpack.c.bf16 %v180_v44, %v180_v44  ;;  %v179_v48 = vsel %vm171_vm8, 0.0, %v144_v42  ;;  %v318_v49 = vadd.f32 %v647_v20, %v317_v46 }
  0xeb   :  { %v406_v50 = vpack.c.bf16 %v179_v48, %v179_v48  ;;  %342 = vst.msk [vmem:[#allocation4 + $0x28] sm:$0xff] %vm336_vm2, %v323_v45  ;;  %v453_v51 = vpop.f32.mrb[6].mxu0 }
  0xec   :  { %221 = vst.msk [vmem:[#allocation2 + $0x14] sm:$0xf] %vm215_vm3, %v407_v47  ;;  %vm174_vm9 = vcmp.ne.f32.partialorder %v453_v51, %v453_v51  ;;  %v154_v52 = vpop.f32.mrb[7].mxu0  ;;  %v473_v53 = vpop.f32.mrb[6].mxu1 }
  0xed   :  { %341 = vst.msk [vmem:[#allocation4 + $0x20] sm:$0xff] %vm336_vm2, %v318_v49  ;;  %v182_v54 = vsel %vm174_vm9, 0.0, %v453_v51  ;;  %vm173_vm10 = vcmp.ne.f32.partialorder %v154_v52, %v154_v52  ;;  %v333_v55 = vadd.f32 %v473_v53, %v647_v20  ;;  %v327_v56 = vpop.f32.mrb[7].mxu1 }
  0xee   :  { %220 = vst.msk [vmem:[#allocation2 + $0x10] sm:$0xf] %vm215_vm3, %v406_v50  ;;  %v409_v57 = vpack.c.bf16 %v182_v54, %v182_v54  ;;  %v181_v58 = vsel %vm173_vm10, 0.0, %v154_v52  ;;  %v328_v59 = vadd.f32 %v647_v20, %v327_v56 }
  0xef   :  { %v408_v60 = vpack.c.bf16 %v181_v58, %v181_v58  ;;  %344 = vst.msk [vmem:[#allocation4 + $0x38] sm:$0xff] %vm336_vm2, %v333_v55 }
  0xf0   :  { %223 = vst.msk [vmem:[#allocation2 + $0x1c] sm:$0xf] %vm215_vm3, %v409_v57 }
  0xf1   :  { %343 = vst.msk [vmem:[#allocation4 + $0x30] sm:$0xff] %vm336_vm2, %v328_v59 }
  0xf2   :  { %222 = vst.msk [vmem:[#allocation2 + $0x18] sm:$0xf] %vm215_vm3, %v408_v60 }
  0xf3   :  { %507 = shalt.err (!%p504_p4)
}
  0xf4   :  { %s508_s30 = scalar_lea.hbm %s709_s5, 1024 }
  0xf5   :  { %p509_p5 = scmp.ne.s32.totalorder %s709_s5, %s508_s30  ;;  %p512_p6 = scmp.lt.u32.totalorder %s508_s30, %s709_s5 }
  0xf7   :  { %p514_p7 = pnand %p512_p6, %p509_p5 }
  0xf9   :  { %517 = shalt.err (!%p514_p7)
}
  0xfa   :  { %s546_s10 = smov 128   ;;  %s547_s1 = smov 8  }
  0xfb   :  { %368 = dma.vmem_to_hbm [thread:$0]  %s363_s26, 1024, %s709_s5, [#allocation5], %s546_s10, %s546_s10, %s547_s1  }
  0xfc   :  { %s518_s12 = scalar_lea.vmem %s668_s3, 512  ;;  %p523_p9 = scmp.lt.s32.totalorder %s668_s3, %s668_s3 }
  0xfd   :  { %p519_p8 = scmp.ne.s32.totalorder %s668_s3, %s518_s12  ;;  %p524_p10 = scmp.lt.s32.totalorder %s518_s12, %s518_s12 }
  0xff   :  { %p525_p11 = por %p524_p10, %p523_p9 }
 0x101   :  { %p526_p12 = pnand %p525_p11, %p519_p8 }
 0x103   :  { %529 = shalt.err (!%p526_p12)
}
 0x104   :  { %s530_s15 = scalar_lea.hbm %s708_s4, 512 }
 0x105   :  { %p531_p13 = scmp.ne.s32.totalorder %s708_s4, %s530_s15  ;;  %p534_p0 = scmp.lt.u32.totalorder %s530_s15, %s708_s4 }
 0x107   :  { %p536_p1 = pnand %p534_p0, %p531_p13 }
 0x109   :  { %539 = shalt.err (!%p536_p1)
}
 0x10a   :  { %s548_s5 = smov 64   ;;  %s549_s20 = smov 4  }
 0x10b   :  { %356 = dma.vmem_to_hbm [thread:$0]  %s668_s3, 512, %s708_s4, [#allocation3], %s548_s5, %s548_s5, %s549_s20  }
 0x10c   :  { %540 = dma.done.wait [#allocation3], 512  }
 0x10d   :  { %541 = vsyncadd [#allocation3], 4294966784 }
 0x10e   :  { %542 = dma.done.wait [#allocation5], 1024  }
 0x10f   :  { %543 = vsyncadd [#allocation5], 4294966272 }
 0x110   :  { %375 = vsyncpa [#allocation3], 1 }
 0x111   :  { %376 = vsyncpa [#allocation5], 1 }

</bundles_post_ra>
